<compile_context>
chip_gen: v7x
topology: tpu7x:2x2x1
jax: 0.10.0
libtpu: 0.0.40
codegen_flags: <defaults>
</compile_context>

<pallas_src>
import jax
import jax.numpy as jnp
from jax import lax
from jax.experimental import pallas as pl
from jax.experimental.pallas import tpu as pltpu

IN_F = 3            # real input features
IN_PAD = 8          # fc1 contraction dim padded 3 -> 8 (sublane alignment)
H1 = 128
H2 = 64
OUT_PAD = 8         # fc3 LHS rows padded 1 -> 8 (MXU M alignment); only row 0 is stored
LANE = 128          # TPU lane width; the batch rides this axis
TB_MAX = 64 * 1024  # max batch rows per grid step (~9 MiB VMEM incl. double buffers)
CHUNK_MAX = 512     # batch rows per inner fc1->fc2->fc3->sigmoid pass
VMEM_LIMIT = 32 * 1024 * 1024  # explicit scoped-VMEM budget, safe on v5e/v6e/v7x


def _round_up(x, m):
    return ((x + m - 1) // m) * m


def _tiles_for_batch(batch):
    """Pick (num_grid_steps, rows_per_step, rows_per_chunk) for a given batch size."""
    b_min = _round_up(max(batch, 1), LANE)
    # Enough steps to respect TB_MAX; >= 2 (and even) when the batch is large enough so
    # both v7x TensorCores get work under dimension_semantics=("parallel",).
    nb = max(pl.cdiv(b_min, TB_MAX), 2 if b_min >= 2 * LANE else 1)
    if nb > 1 and nb % 2 == 1:
        nb += 1
    rows = pl.cdiv(b_min, nb)
    unit = CHUNK_MAX if rows >= CHUNK_MAX else LANE
    tb = _round_up(rows, unit)
    chunk = min(CHUNK_MAX, tb)  # divides tb by construction
    return nb, tb, chunk


def _make_kernel(chunk, n_chunks):
    unroll = n_chunks <= 8  # short fixed trip counts: unroll for scheduler visibility

    def kernel(x_ref, w1_ref, b1_ref, w2_ref, b2_ref, w3_ref, b3_ref, o_ref):
        # Weights / biases are tiny and VMEM-resident: load once, reuse for every chunk.
        w1 = w1_ref[...]   # (128, 8)
        b1 = b1_ref[...]   # (128, 1)
        w2 = w2_ref[...]   # (64, 128)
        b2 = b2_ref[...]   # (64, 1)
        w3 = w3_ref[...]   # (8, 64)   rows 1..7 are zero
        b3 = b3_ref[...]   # (1, 1)

        def body(c, carry):
            col = pl.multiple_of(c * chunk, chunk)
            xc = x_ref[:, pl.ds(col, chunk)]                           # (8, chunk) f32
            h1 = jnp.dot(w1, xc, preferred_element_type=jnp.float32)   # (128, chunk)
            h1 = jnp.maximum(h1 + b1, 0.0)
            h2 = jnp.dot(w2, h1, preferred_element_type=jnp.float32)   # (64, chunk)
            h2 = jnp.maximum(h2 + b2, 0.0)
            z = jnp.dot(w3, h2, preferred_element_type=jnp.float32)    # (8, chunk)
            # Lane-dense store: full 128-lane vst into the (1, tb) output block.
            o_ref[:, pl.ds(col, chunk)] = jax.nn.sigmoid(z[0:1, :] + b3)
            return carry

        lax.fori_loop(0, n_chunks, body, 0, unroll=unroll)

    return kernel


def color_memory_mlp(x, w1, b1, w2, b2, w3, b3):
    """Forward pass of ColorMemoryCNN.

    x : (B, 3) float32
    w1: (3, 128)  b1: (128,)
    w2: (128, 64) b2: (64,)
    w3: (64, 1)   b3: (1,)
    returns (B, 1) float32 in (0, 1)
    """
    batch = x.shape[0]
    nb, tb, chunk = _tiles_for_batch(batch)
    b_pad = nb * tb
    n_chunks = tb // chunk
    f32 = jnp.float32

    # Single small staging pass: transpose + pad so the batch is lane-dense in-kernel.
    x_t = jnp.zeros((IN_PAD, b_pad), f32).at[:IN_F, :batch].set(x.astype(f32).T)
    w1_t = jnp.zeros((H1, IN_PAD), f32).at[:, :IN_F].set(w1.astype(f32).T)
    b1_c = b1.reshape(H1, 1).astype(f32)
    w2_t = w2.astype(f32).T                                            # (64, 128)
    b2_c = b2.reshape(H2, 1).astype(f32)
    w3_t = jnp.zeros((OUT_PAD, H2), f32).at[0, :].set(w3.astype(f32)[:, 0])
    b3_c = b3.reshape(1, 1).astype(f32)

    # Weights / biases: constant index_map -> fetched once, VMEM-resident across all steps.
    resident = lambda shape: pl.BlockSpec(shape, lambda i: (0,) * len(shape))

    out_t = pl.pallas_call(
        _make_kernel(chunk, n_chunks),
        out_shape=jax.ShapeDtypeStruct((1, b_pad), f32),
        grid=(nb,),
        in_specs=[
            pl.BlockSpec((IN_PAD, tb), lambda i: (0, i)),   # x^T tile moves along lanes
            resident((H1, IN_PAD)),
            resident((H1, 1)),
            resident((H2, H1)),
            resident((H2, 1)),
            resident((OUT_PAD, H2)),
            resident((1, 1)),
        ],
        out_specs=pl.BlockSpec((1, tb), lambda i: (0, i)),  # lane-dense (1, b_pad) output
        compiler_params=pltpu.CompilerParams(
            dimension_semantics=("parallel",),              # v7x: 2 TCs share batch tiles
            vmem_limit_bytes=VMEM_LIMIT,
        ),
    )(x_t, w1_t, b1_c, w2_t, b2_c, w3_t, b3_c)

    # Padded lanes (columns >= batch) hold sigmoid(bias-only activations); slice them off.
    return out_t[0, :batch].reshape(batch, 1)


def init_params(key):
    """Deterministic init mimicking PyTorch's default Linear init
    (uniform(-1/sqrt(fan_in), 1/sqrt(fan_in)) for weights and biases)."""
    def linear(key, fan_in, fan_out):
        kw, kb = jax.random.split(key)
        bound = 1.0 / jnp.sqrt(float(fan_in))
        w = jax.random.uniform(kw, (fan_in, fan_out), jnp.float32, -bound, bound)
        b = jax.random.uniform(kb, (fan_out,), jnp.float32, -bound, bound)
        return w, b

    k1, k2, k3 = jax.random.split(key, 3)
    w1, b1 = linear(k1, 3, 128)
    w2, b2 = linear(k2, 128, 64)
    w3, b3 = linear(k3, 64, 1)
    return w1, b1, w2, b2, w3, b3


def reference_forward(x, w1, b1, w2, b2, w3, b3):
    h = jnp.maximum(x @ w1 + b1, 0.0)
    h = jnp.maximum(h @ w2 + b2, 0.0)
    return jax.nn.sigmoid(h @ w3 + b3)


if __name__ == "__main__":
    key = jax.random.PRNGKey(0)
    kx, kp = jax.random.split(key)

    # Small batch of RGB-like inputs: (B, 3)
    B = 2
    x = jax.random.uniform(kx, (B, 3), jnp.float32)
    params = init_params(kp)

    out = color_memory_mlp(x, *params)
    out = jax.block_until_ready(out)

    ref = reference_forward(x, *params)
    assert out.shape == (B, 1)
    # All-f32 compute path (no bf16 casts): tolerance tightened vs the previous version.
    assert jnp.allclose(out, ref, atol=5e-3, rtol=5e-3), (out, ref)

    print("KERNEL_OK")
</pallas_src>

<mosaic_0001>
module attributes {stable_mosaic.version = 11 : i64} {
  func.func @kernel(%arg0: i32, %arg1: memref<8x128xf32, #tpu.memory_space<vmem>>, %arg2: memref<128x8xf32, #tpu.memory_space<vmem>>, %arg3: memref<128x1xf32, #tpu.memory_space<vmem>>, %arg4: memref<64x128xf32, #tpu.memory_space<vmem>>, %arg5: memref<64x1xf32, #tpu.memory_space<vmem>>, %arg6: memref<8x64xf32, #tpu.memory_space<vmem>>, %arg7: memref<1x1xf32, #tpu.memory_space<vmem>>, %arg8: memref<1x128xf32, #tpu.memory_space<vmem>>) attributes {dimension_semantics = [#tpu.dimension_semantics<parallel>], iteration_bounds = array<i64: 1>, scalar_prefetch = 0 : i64, scratch_operands = 0 : i64, tpu.core_type = #tpu.core_type<tc>, window_params = [{transform_indices = @transform_0, window_bounds = array<i64: 8, 128>}, {pipeline_mode = #tpu.pipeline_mode<synchronous>, transform_indices = @transform_1, window_bounds = array<i64: 128, 8>}, {pipeline_mode = #tpu.pipeline_mode<synchronous>, transform_indices = @transform_2, window_bounds = array<i64: 128, 1>}, {pipeline_mode = #tpu.pipeline_mode<synchronous>, transform_indices = @transform_3, window_bounds = array<i64: 64, 128>}, {pipeline_mode = #tpu.pipeline_mode<synchronous>, transform_indices = @transform_4, window_bounds = array<i64: 64, 1>}, {pipeline_mode = #tpu.pipeline_mode<synchronous>, transform_indices = @transform_5, window_bounds = array<i64: 8, 64>}, {pipeline_mode = #tpu.pipeline_mode<synchronous>, transform_indices = @transform_6, window_bounds = array<i64: 1, 1>}, {transform_indices = @transform_7, window_bounds = array<i64: 1, 128>}]} {
    %c0 = arith.constant 0 : index
    %c0_0 = arith.constant 0 : index
    %0 = vector.load %arg2[%c0, %c0_0] : memref<128x8xf32, #tpu.memory_space<vmem>>, vector<128x8xf32>
    %c0_1 = arith.constant 0 : index
    %c0_2 = arith.constant 0 : index
    %1 = vector.load %arg3[%c0_1, %c0_2] : memref<128x1xf32, #tpu.memory_space<vmem>>, vector<128x1xf32>
    %c0_3 = arith.constant 0 : index
    %c0_4 = arith.constant 0 : index
    %2 = vector.load %arg4[%c0_3, %c0_4] : memref<64x128xf32, #tpu.memory_space<vmem>>, vector<64x128xf32>
    %c0_5 = arith.constant 0 : index
    %c0_6 = arith.constant 0 : index
    %3 = vector.load %arg5[%c0_5, %c0_6] : memref<64x1xf32, #tpu.memory_space<vmem>>, vector<64x1xf32>
    %c0_7 = arith.constant 0 : index
    %c0_8 = arith.constant 0 : index
    %4 = vector.load %arg6[%c0_7, %c0_8] : memref<8x64xf32, #tpu.memory_space<vmem>>, vector<8x64xf32>
    %c0_9 = arith.constant 0 : index
    %c0_10 = arith.constant 0 : index
    %5 = vector.load %arg7[%c0_9, %c0_10] : memref<1x1xf32, #tpu.memory_space<vmem>>, vector<1x1xf32>
    %c0_i32 = arith.constant 0 : i32
    %c128_i32 = arith.constant 128 : i32
    %6 = arith.muli %c0_i32, %c128_i32 : i32
    %7 = tpu.assume_multiple %6, 128 : i32
    %c0_11 = arith.constant 0 : index
    %8 = arith.index_cast %7 : i32 to index
    %9 = vector.load %arg1[%c0_11, %8] : memref<8x128xf32, #tpu.memory_space<vmem>>, vector<8x128xf32>
    %cst = arith.constant dense<0.000000e+00> : vector<128x128xf32>
    %10 = tpu.matmul %0, %9, %cst {dimension_numbers = #tpu.dot_dimension_numbers<[1], [0], [0], [1], [0, 0, 1, 1], [], []>} : vector<128x8xf32>, vector<8x128xf32>, vector<128x128xf32> -> vector<128x128xf32>
    %11 = vector.broadcast %1 : vector<128x1xf32> to vector<128x128xf32>
    %12 = arith.addf %10, %11 : vector<128x128xf32>
    %cst_12 = arith.constant 0.000000e+00 : f32
    %13 = vector.broadcast %cst_12 : f32 to vector<128x128xf32>
    %14 = arith.maximumf %12, %13 : vector<128x128xf32>
    %cst_13 = arith.constant dense<0.000000e+00> : vector<64x128xf32>
    %15 = tpu.matmul %2, %14, %cst_13 {dimension_numbers = #tpu.dot_dimension_numbers<[1], [0], [0], [1], [0, 0, 1, 1], [], []>} : vector<64x128xf32>, vector<128x128xf32>, vector<64x128xf32> -> vector<64x128xf32>
    %16 = vector.broadcast %3 : vector<64x1xf32> to vector<64x128xf32>
    %17 = arith.addf %15, %16 : vector<64x128xf32>
    %cst_14 = arith.constant 0.000000e+00 : f32
    %18 = vector.broadcast %cst_14 : f32 to vector<64x128xf32>
    %19 = arith.maximumf %17, %18 : vector<64x128xf32>
    %cst_15 = arith.constant dense<0.000000e+00> : vector<8x128xf32>
    %20 = tpu.matmul %4, %19, %cst_15 {dimension_numbers = #tpu.dot_dimension_numbers<[1], [0], [0], [1], [0, 0, 1, 1], [], []>} : vector<8x64xf32>, vector<64x128xf32>, vector<8x128xf32> -> vector<8x128xf32>
    %21 = vector.extract_strided_slice %20 {offsets = [0, 0], sizes = [1, 128], strides = [1, 1]} : vector<8x128xf32> to vector<1x128xf32>
    %22 = vector.broadcast %5 : vector<1x1xf32> to vector<1x128xf32>
    %23 = arith.addf %21, %22 : vector<1x128xf32>
    %24 = arith.negf %23 : vector<1x128xf32>
    %25 = math.exp %24 : vector<1x128xf32>
    %cst_16 = arith.constant 1.000000e+00 : f32
    %26 = vector.broadcast %cst_16 : f32 to vector<1x128xf32>
    %27 = arith.addf %26, %25 : vector<1x128xf32>
    %28 = arith.divf %26, %27 : vector<1x128xf32>
    %c0_17 = arith.constant 0 : index
    %29 = arith.index_cast %7 : i32 to index
    %30 = vector.load %arg8[%c0_17, %29] : memref<1x128xf32, #tpu.memory_space<vmem>>, vector<1x128xf32>
    tpu.vector_store %arg8[%c0_17, %29], %28 {strides = array<i32>} : memref<1x128xf32, #tpu.memory_space<vmem>>, vector<1x128xf32>,
    %c1_i32 = arith.constant 1 : i32
    return
  }
  func.func @transform_0(%arg0: i32) -> (i32, i32) {
    %c0_i32 = arith.constant 0 : i32
    %c0_i32_0 = arith.constant 0 : i32
    return %c0_i32, %arg0 : i32, i32
  }
  func.func @transform_1(%arg0: i32) -> (i32, i32) {
    %c0_i32 = arith.constant 0 : i32
    %c0_i32_0 = arith.constant 0 : i32
    %c0_i32_1 = arith.constant 0 : i32
    return %c0_i32, %c0_i32_0 : i32, i32
  }
  func.func @transform_2(%arg0: i32) -> (i32, i32) {
    %c0_i32 = arith.constant 0 : i32
    %c0_i32_0 = arith.constant 0 : i32
    %c0_i32_1 = arith.constant 0 : i32
    return %c0_i32, %c0_i32_0 : i32, i32
  }
  func.func @transform_3(%arg0: i32) -> (i32, i32) {
    %c0_i32 = arith.constant 0 : i32
    %c0_i32_0 = arith.constant 0 : i32
    %c0_i32_1 = arith.constant 0 : i32
    return %c0_i32, %c0_i32_0 : i32, i32
  }
  func.func @transform_4(%arg0: i32) -> (i32, i32) {
    %c0_i32 = arith.constant 0 : i32
    %c0_i32_0 = arith.constant 0 : i32
    %c0_i32_1 = arith.constant 0 : i32
    return %c0_i32, %c0_i32_0 : i32, i32
  }
  func.func @transform_5(%arg0: i32) -> (i32, i32) {
    %c0_i32 = arith.constant 0 : i32
    %c0_i32_0 = arith.constant 0 : i32
    %c0_i32_1 = arith.constant 0 : i32
    return %c0_i32, %c0_i32_0 : i32, i32
  }
  func.func @transform_6(%arg0: i32) -> (i32, i32) {
    %c0_i32 = arith.constant 0 : i32
    %c0_i32_0 = arith.constant 0 : i32
    %c0_i32_1 = arith.constant 0 : i32
    return %c0_i32, %c0_i32_0 : i32, i32
  }
  func.func @transform_7(%arg0: i32) -> (i32, i32) {
    %c0_i32 = arith.constant 0 : i32
    %c0_i32_0 = arith.constant 0 : i32
    return %c0_i32, %arg0 : i32, i32
  }
}

</mosaic_0001>

<bundles_post_ra>
// kernel: tpu_custom_call.1
= control target key start
LH: loop header
LB: loop body
LE: loop exit
PB: predicated region body
PF: predicated region fallthrough
CT: control target
= control target key end

     0   :  { %s1090_s0 = inlined_call_operand.vmem [shape: f32[8,128], index: 0, kind: input, shape index: {}]   ;;  %s1091_s1 = inlined_call_operand.vmem [shape: f32[128,8], index: 1, kind: input, shape index: {}]   ;;  %s1092_s2 = inlined_call_operand.vmem [shape: f32[128,1], index: 2, kind: input, shape index: {}]   ;;  %s1093_s3 = inlined_call_operand.vmem [shape: f32[64,128], index: 3, kind: input, shape index: {}]   ;;  %s1094_s4 = inlined_call_operand.vmem [shape: f32[64,1], index: 4, kind: input, shape index: {}]   ;;  %s1095_s5 = inlined_call_operand.vmem [shape: f32[8,64], index: 5, kind: input, shape index: {}]   ;;  %s1096_s6 = inlined_call_operand.<no memory space> [shape: f32[1,1], index: 6, kind: input, shape index: {}]   ;;  %s1097_s7 = inlined_call_operand.hbm [shape: f32[1,128], index: 7, kind: output, shape index: {}]  }
   0x1   :  { %v12_v0 = vstv %s1096_s6 }
   0x2   :  { %13 = vst [vmem:[#allocation2] sm:$0x1] %v12_v0 }
   0x3   :  { %v79_v1 = vld [vmem:[%s1090_s0] sm:$0xff]  ;;  %vm160_vm0 = vcmask 64512   ;;  %v30_v3 = vld [vmem:[%s1091_s1 + $0x8] sm:$0xff]  ;;  %v31_v4 = vld [vmem:[%s1091_s1 + $0x10] sm:$0xff]  ;;  %v864_v5 = vmov 0  }
   0x4   :  { %v29_v2 = vld [vmem:[%s1091_s1] sm:$0xff]  ;;  %696 = vmatprep.subr.mxu0 %v79_v1  ;;  %834 = vset.pattern.permute.xlu0 %v864_v5  ;;  %v32_v6 = vld [vmem:[%s1091_s1 + $0x18] sm:$0xff]  ;;  %v47_v9 = vld [vmem:[%s1092_s2 + $0x10] sm:$0xff] }
   0x5   :  { %698 = vmatprep.mubr.msk.f32.mxu0 %vm160_vm0, %v29_v2  ;;  %697 = vmatpush3.msra.mxu0 %v79_v1  ;;  %v33_v7 = vld [vmem:[%s1091_s1 + $0x20] sm:$0xff]  ;;  %v46_v10 = vld [vmem:[%s1092_s2 + $0x8] sm:$0xff]  ;;  %v48_v12 = vld [vmem:[%s1092_s2 + $0x18] sm:$0xff] }
   0x6   :  { %699 = vmatmul.mubr.msk.f32.vlgmr.msra.gmra.mrb[0].mxu0 %vm160_vm0, %v30_v3  ;;  %835 = vset.pattern.permute.xlu1 %v864_v5  ;;  %v45_v8 = vld [vmem:[%s1092_s2] sm:$0xff]  ;;  %v34_v11 = vld [vmem:[%s1091_s1 + $0x28] sm:$0xff]  ;;  %v35_v13 = vld [vmem:[%s1091_s1 + $0x30] sm:$0xff] }
   0x7   :  { %701 = vmatprep.mubr.msk.f32.mxu0 %vm160_vm0, %v31_v4  ;;  %82 = vperm.xlu0 %834, %v45_v8   ;;  %v49_v14 = vld [vmem:[%s1092_s2 + $0x20] sm:$0xff]  ;;  %v36_v15 = vld [vmem:[%s1091_s1 + $0x38] sm:$0xff]  ;;  %v50_v16 = vld [vmem:[%s1092_s2 + $0x28] sm:$0xff] }
   0x8   :  { %92 = vperm.xlu1 %835, %v47_v9   ;;  %v37_v17 = vld [vmem:[%s1091_s1 + $0x40] sm:$0xff] }
   0xa   :  { %702 = vmatmul.mubr.msk.f32.gmra.mrb[2].mxu0 %vm160_vm0, %v32_v6 }
   0xb   :  { %704 = vmatprep.mubr.msk.f32.mxu0 %vm160_vm0, %v33_v7  ;;  %87 = vperm.xlu0 %834, %v46_v10  }
   0xc   :  { %97 = vperm.xlu1 %835, %v48_v12  }
   0xe   :  { %705 = vmatmul.mubr.msk.f32.gmra.mrb[4].mxu0 %vm160_vm0, %v34_v11 }
   0xf   :  { %707 = vmatprep.mubr.msk.f32.mxu0 %vm160_vm0, %v35_v13  ;;  %102 = vperm.xlu0 %834, %v49_v14  }
  0x10   :  { %14 = vsyncpa [#allocation4], 0  ;;  %v51_v18 = vld [vmem:[%s1092_s2 + $0x30] sm:$0xff]  ;;  %107 = vperm.xlu1 %835, %v50_v16   ;;  %v38_v19 = vld [vmem:[%s1091_s1 + $0x48] sm:$0xff]  ;;  %vm866_vm1 = vmmov 0   ;;  %vm523_vm2 = vcmask 523264  }
  0x11   :  { %v52_v20 = vld [vmem:[%s1092_s2 + $0x38] sm:$0xff]  ;;  %v39_v21 = vld [vmem:[%s1091_s1 + $0x50] sm:$0xff]  ;;  %v53_v22 = vld [vmem:[%s1092_s2 + $0x40] sm:$0xff]  ;;  %s868_s21 = smov [#allocation3]  }
  0x12   :  { %708 = vmatmul.mubr.msk.f32.gmra.mrb[6].mxu0 %vm160_vm0, %v36_v15  ;;  %v40_v23 = vld [vmem:[%s1091_s1 + $0x58] sm:$0xff]  ;;  %v54_v24 = vld [vmem:[%s1092_s2 + $0x48] sm:$0xff]  ;;  %v41_v25 = vld [vmem:[%s1091_s1 + $0x60] sm:$0xff]  ;;  %s620_s22 = sshll.u32 %s868_s21, 4  ;;  %s621_s22 = int_to_ptr.vmem [resolvable:$true] %s620_s22 }
  0x13   :  { %710 = vmatprep.mubr.msk.f32.mxu0 %vm160_vm0, %v37_v17  ;;  %112 = vperm.xlu0 %834, %v51_v18   ;;  %v55_v26 = vld [vmem:[%s1092_s2 + $0x50] sm:$0xff]  ;;  %v42_v27 = vld [vmem:[%s1091_s1 + $0x68] sm:$0xff]  ;;  %v56_v28 = vld [vmem:[%s1092_s2 + $0x58] sm:$0xff]  ;;  %s844_s23 = scalar_lea.vmem %s621_s22, 32  ;;  %p845_p1 = scmp.lt.s32.totalorder %s621_s22, %s621_s22 }
  0x14   :  { %117 = vperm.xlu1 %835, %v52_v20   ;;  %v43_v29 = vld [vmem:[%s1091_s1 + $0x70] sm:$0xff]  ;;  %v57_v30 = vld [vmem:[%s1092_s2 + $0x60] sm:$0xff]  ;;  %v44_v31 = vld [vmem:[%s1091_s1 + $0x78] sm:$0xff] }
  0x15   :  { %v58_v32 = vld [vmem:[%s1092_s2 + $0x68] sm:$0xff]  ;;  %v59_v33 = vld [vmem:[%s1092_s2 + $0x70] sm:$0xff]  ;;  %v60_v34 = vld [vmem:[%s1092_s2 + $0x78] sm:$0xff] }
  0x16   :  { %711 = vmatmul.mubr.msk.f32.gmra.mrb[8].mxu0 %vm160_vm0, %v38_v19  ;;  %v69_v35 = vld [vmem:[%s1094_s4] sm:$0xff]  ;;  %v70_v36 = vld [vmem:[%s1094_s4 + $0x8] sm:$0xff]  ;;  %v71_v37 = vld [vmem:[%s1094_s4 + $0x10] sm:$0xff] }
  0x17   :  { %713 = vmatprep.mubr.msk.f32.mxu0 %vm160_vm0, %v39_v21  ;;  %122 = vperm.xlu0 %834, %v53_v22   ;;  %v72_v38 = vld [vmem:[%s1094_s4 + $0x18] sm:$0xff]  ;;  %v73_v39 = vld [vmem:[%s1094_s4 + $0x20] sm:$0xff]  ;;  %v74_v40 = vld [vmem:[%s1094_s4 + $0x28] sm:$0xff] }
  0x18   :  { %127 = vperm.xlu1 %835, %v54_v24   ;;  %v75_v41 = vld [vmem:[%s1094_s4 + $0x30] sm:$0xff]  ;;  %v76_v42 = vld [vmem:[%s1094_s4 + $0x38] sm:$0xff]  ;;  %v78_v43 = vld [vmem:[#allocation2] sm:$0x1] }
  0x19   :  { %v61_v44 = vld [vmem:[%s1093_s3] sm:$0xff] }
  0x1a   :  { %714 = vmatmul.mubr.msk.f32.gmra.mrb[10].mxu0 %vm160_vm0, %v40_v23  ;;  %754 = vmatprep.mubr.f32.mxu1 %v61_v44 }
  0x1b   :  { %716 = vmatprep.mubr.msk.f32.mxu0 %vm160_vm0, %v41_v25  ;;  %132 = vperm.xlu0 %834, %v55_v26  }
  0x1c   :  { %137 = vperm.xlu1 %835, %v56_v28  }
  0x1e   :  { %717 = vmatmul.mubr.msk.f32.gmra.mrb[12].mxu0 %vm160_vm0, %v42_v27 }
  0x1f   :  { %719 = vmatprep.mubr.msk.f32.mxu0 %vm160_vm0, %v43_v29  ;;  %142 = vperm.xlu0 %834, %v57_v30  }
  0x20   :  { %147 = vperm.xlu1 %835, %v58_v32  }
  0x22   :  { %720 = vmatmul.mubr.msk.f32.gmra.mrb[14].mxu0 %vm160_vm0, %v44_v31 }
  0x23   :  { %152 = vperm.xlu0 %834, %v59_v33  }
  0x24   :  { %157 = vperm.xlu1 %835, %v60_v34  }
  0x27   :  { %372 = vperm.xlu0 %834, %v69_v35  }
  0x28   :  { %377 = vperm.xlu1 %835, %v70_v36  }
  0x2b   :  { %382 = vperm.xlu0 %834, %v71_v37  }
  0x2c   :  { %387 = vperm.xlu1 %835, %v72_v38  }
  0x2f   :  { %392 = vperm.xlu0 %834, %v73_v39  }
  0x30   :  { %397 = vperm.xlu1 %835, %v74_v40  }
  0x33   :  { %402 = vperm.xlu0 %834, %v75_v41  }
  0x34   :  { %407 = vperm.xlu1 %835, %v76_v42  }
  0x37   :  { %599 = vperm.xlu0 %834, %v78_v43  }
  0x86   :  { %v83_v46 = vpop.permute.xlu0 %82 }
  0x87   :  { %v93_v45 = vpop.permute.xlu1 %92 }
  0x8a   :  { %v88_v48 = vpop.permute.xlu0 %87 }
  0x8b   :  { %v98_v47 = vpop.permute.xlu1 %97 }
  0x8e   :  { %v103_v50 = vpop.permute.xlu0 %102 }
  0x8f   :  { %v108_v49 = vpop.permute.xlu1 %107 }
  0x92   :  { %v113_v59 = vpop.permute.xlu0 %112 }
  0x93   :  { %v118_v56 = vpop.permute.xlu1 %117 }
  0x96   :  { %v123_v8 = vpop.permute.xlu0 %122 }
  0x97   :  { %v128_v5 = vpop.permute.xlu1 %127 }
  0x9a   :  { %v133_v20 = vpop.permute.xlu0 %132 }
  0x9b   :  { %v138_v17 = vpop.permute.xlu1 %137 }
  0x9e   :  { %v143_v33 = vpop.permute.xlu0 %142 }
  0x9f   :  { %v148_v30 = vpop.permute.xlu1 %147 }
  0xa3   :  { %v158_v42 = vpop.permute.xlu1 %157 }
  0xd9   :  { %v700_v51 = vpop.f32.mrb[0].mxu0 }
  0xda   :  { %v281_v52 = vadd.f32 %v700_v51, %v88_v48  ;;  %v275_v53 = vpop.f32.mrb[1].mxu0 }
  0xdb   :  { %v276_v54 = vadd.f32 %v275_v53, %v83_v46  ;;  %v62_v53 = vld [vmem:[%s1093_s3 + $0x8] sm:$0xff] }
  0xdc   :  { %v355_v55 = vmax.f32 %v281_v52, 0.0 }
  0xdd   :  { %v354_v57 = vmax.f32 %v276_v54, 0.0  ;;  %v703_v58 = vpop.f32.mrb[2].mxu0  ;;  %v63_v54 = vld [vmem:[%s1093_s3 + $0x10] sm:$0xff] }
  0xde   :  { %v291_v60 = vadd.f32 %v703_v58, %v98_v47  ;;  %v285_v61 = vpop.f32.mrb[3].mxu0  ;;  %v67_v58 = vld [vmem:[%s1093_s3 + $0x30] sm:$0xff] }
  0xdf   :  { %v286_v62 = vadd.f32 %v285_v61, %v93_v45  ;;  %v785_v63 = vpack.c.bf16 %v355_v55, %v354_v57  ;;  %v153_v45 = vpop.permute.xlu0 %152  ;;  %v64_v55 = vld [vmem:[%s1093_s3 + $0x18] sm:$0xff]  ;;  %v66_v57 = vld [vmem:[%s1093_s3 + $0x28] sm:$0xff]  ;;  %v867_v61 = vmov 0.0  }
  0xe0   :  { %v357_v0 = vmax.f32 %v291_v60, 0.0  ;;  %v865_v60 = vmov 0.0|0.0   ;;  %782 = vmatprep.mubr.msk.f32.mxu0 %vm866_vm1, %v867_v61 }
  0xe1   :  { %v356_v1 = vmax.f32 %v286_v62, 0.0  ;;  %v706_v2 = vpop.f32.mrb[4].mxu0  ;;  %786 = vmatprep.subr.bf16.mxu1 %v785_v63  ;;  %817 = vmatprep.subr.bf16.mxu0 %v865_v60  ;;  %v378_v62 = vpop.permute.xlu1 %377 }
  0xe2   :  { %v301_v3 = vadd.f32 %v706_v2, %v108_v49  ;;  %v295_v4 = vpop.f32.mrb[5].mxu0  ;;  %788 = vmatpush3.bf16.msra.mxu1 %v785_v63 }
  0xe3   :  { %v789_v6 = vpack.c.bf16 %v357_v0, %v356_v1  ;;  %v296_v7 = vadd.f32 %v295_v4, %v103_v50  ;;  %v373_v63 = vpop.permute.xlu0 %372 }
  0xe4   :  { %v359_v9 = vmax.f32 %v301_v3, 0.0 }
  0xe5   :  { %v358_v10 = vmax.f32 %v296_v7, 0.0  ;;  %v709_v11 = vpop.f32.mrb[6].mxu0  ;;  %790 = vmatprep.subr.bf16.mxu1 %v789_v6  ;;  %v388_v0 = vpop.permute.xlu1 %387 }
  0xe6   :  { %v311_v12 = vadd.f32 %v709_v11, %v118_v56  ;;  %v305_v13 = vpop.f32.mrb[7].mxu0  ;;  %792 = vmatpush3.bf16.msra.mxu1 %v789_v6  ;;  %v65_v56 = vld [vmem:[%s1093_s3 + $0x20] sm:$0xff] }
  0xe7   :  { %v793_v14 = vpack.c.bf16 %v359_v9, %v358_v10  ;;  %v306_v15 = vadd.f32 %v305_v13, %v113_v59  ;;  %v68_v59 = vld [vmem:[%s1093_s3 + $0x38] sm:$0xff]  ;;  %v383_v2 = vpop.permute.xlu0 %382 }
  0xe8   :  { %v361_v16 = vmax.f32 %v311_v12, 0.0 }
  0xe9   :  { %v360_v18 = vmax.f32 %v306_v15, 0.0  ;;  %v712_v19 = vpop.f32.mrb[8].mxu0  ;;  %794 = vmatprep.subr.bf16.mxu1 %v793_v14  ;;  %v398_v11 = vpop.permute.xlu1 %397 }
  0xea   :  { %v321_v21 = vadd.f32 %v712_v19, %v128_v5  ;;  %v315_v22 = vpop.f32.mrb[9].mxu0  ;;  %796 = vmatpush3.bf16.msra.mxu1 %v793_v14 }
  0xeb   :  { %v797_v23 = vpack.c.bf16 %v361_v16, %v360_v18  ;;  %v316_v24 = vadd.f32 %v315_v22, %v123_v8  ;;  %v393_v14 = vpop.permute.xlu0 %392 }
  0xec   :  { %v363_v25 = vmax.f32 %v321_v21, 0.0 }
  0xed   :  { %v362_v26 = vmax.f32 %v316_v24, 0.0  ;;  %v715_v27 = vpop.f32.mrb[10].mxu0  ;;  %798 = vmatprep.subr.bf16.mxu1 %v797_v23 }
  0xee   :  { %v331_v28 = vadd.f32 %v715_v27, %v138_v17  ;;  %v325_v29 = vpop.f32.mrb[11].mxu0  ;;  %800 = vmatpush3.bf16.msra.mxu1 %v797_v23  ;;  %v408_v23 = vpop.permute.xlu1 %407 }
  0xef   :  { %v801_v31 = vpack.c.bf16 %v363_v25, %v362_v26  ;;  %v326_v32 = vadd.f32 %v325_v29, %v133_v20  ;;  %v403_v26 = vpop.permute.xlu0 %402 }
  0xf0   :  { %v365_v34 = vmax.f32 %v331_v28, 0.0 }
  0xf1   :  { %v364_v35 = vmax.f32 %v326_v32, 0.0  ;;  %v718_v36 = vpop.f32.mrb[12].mxu0  ;;  %802 = vmatprep.subr.bf16.mxu1 %v801_v31 }
  0xf2   :  { %v341_v37 = vadd.f32 %v718_v36, %v148_v30  ;;  %v335_v38 = vpop.f32.mrb[13].mxu0  ;;  %804 = vmatpush3.bf16.msra.mxu1 %v801_v31 }
  0xf3   :  { %v805_v39 = vpack.c.bf16 %v365_v34, %v364_v35  ;;  %v336_v40 = vadd.f32 %v335_v38, %v143_v33  ;;  %v77_v34 = vld [vmem:[%s1095_s5] sm:$0xff]  ;;  %v602_v35 = vlaneseq  ;;  %v600_v38 = vpop.permute.xlu0 %599  ;;  %s840_s5 = scalar_lea.vmem %s621_s22, 16 }
  0xf4   :  { %v367_v41 = vmax.f32 %v341_v37, 0.0  ;;  %p841_p0 = scmp.ne.s32.totalorder %s621_s22, %s840_s5  ;;  %p846_p2 = scmp.lt.s32.totalorder %s844_s23, %s840_s5 }
  0xf5   :  { %v366_v43 = vmax.f32 %v336_v40, 0.0  ;;  %v721_v44 = vpop.f32.mrb[14].mxu0  ;;  %806 = vmatprep.subr.bf16.mxu1 %v805_v39  ;;  %v603_v36 = vshrl.u32 %v602_v35, 7 }
  0xf6   :  { %v351_v46 = vadd.f32 %v721_v44, %v158_v42  ;;  %v345_v47 = vpop.f32.mrb[15].mxu0  ;;  %808 = vmatpush3.bf16.msra.mxu1 %v805_v39  ;;  %p847_p3 = por %p846_p2, %p845_p1 }
  0xf7   :  { %v809_v48 = vpack.c.bf16 %v367_v41, %v366_v43  ;;  %v346_v49 = vadd.f32 %v345_v47, %v153_v45  ;;  %v604_v37 = vsub.s32 0, %v603_v36 }
  0xf8   :  { %v369_v50 = vmax.f32 %v351_v46, 0.0  ;;  %p848_p4 = pnand %p847_p3, %p841_p0 }
  0xf9   :  { %v368_v51 = vmax.f32 %v346_v49, 0.0  ;;  %810 = vmatprep.subr.bf16.mxu1 %v809_v48  ;;  %v605_v39 = vrot.slane %v600_v38, %v604_v37 }
  0xfa   :  { %812 = vmatpush3.bf16.msra.mxu1 %v809_v48 }
  0xfb   :  { %v813_v52 = vpack.c.bf16 %v369_v50, %v368_v51 }
  0xfd   :  { %814 = vmatprep.subr.bf16.mxu1 %v813_v52 }
  0xfe   :  { %816 = vmatpush3.bf16.msra.mxu1 %v813_v52 }
 0x101   :  { %755 = vmatmul.mubr.f32.vlgmr.msra.gmra.mrb[0].mxu1 %v62_v53 }
 0x102   :  { %757 = vmatprep.mubr.f32.mxu1 %v63_v54 }
 0x105   :  { %758 = vmatmul.mubr.f32.gmra.mrb[2].mxu1 %v64_v55 }
 0x106   :  { %760 = vmatprep.mubr.f32.mxu1 %v65_v56 }
 0x109   :  { %761 = vmatmul.mubr.f32.gmra.mrb[4].mxu1 %v66_v57 }
 0x10a   :  { %763 = vmatprep.mubr.f32.mxu1 %v67_v58 }
 0x10d   :  { %764 = vmatmul.mubr.f32.gmra.mrb[6].mxu1 %v68_v59 }
 0x1d4   :  { %v756_v1 = vpop.f32.mrb[0].mxu1 }
 0x1d5   :  { %v482_v3 = vadd.f32 %v756_v1, %v378_v62  ;;  %v476_v4 = vpop.f32.mrb[1].mxu1 }
 0x1d6   :  { %v477_v5 = vadd.f32 %v476_v4, %v373_v63 }
 0x1d7   :  { %v516_v6 = vmax.f32 %v482_v3, 0.0 }
 0x1d8   :  { %v515_v7 = vmax.f32 %v477_v5, 0.0  ;;  %v759_v8 = vpop.f32.mrb[2].mxu1 }
 0x1d9   :  { %v492_v9 = vadd.f32 %v759_v8, %v388_v0  ;;  %v486_v10 = vpop.f32.mrb[3].mxu1 }
 0x1da   :  { %v818_v12 = vpack.c.bf16 %v516_v6, %v515_v7  ;;  %v487_v13 = vadd.f32 %v486_v10, %v383_v2 }
 0x1db   :  { %v518_v15 = vmax.f32 %v492_v9, 0.0 }
 0x1dc   :  { %v517_v16 = vmax.f32 %v487_v13, 0.0  ;;  %v762_v17 = vpop.f32.mrb[4].mxu1  ;;  %819 = vmatpush3.bf16.msra.mxu0 %v818_v12 }
 0x1dd   :  { %v502_v18 = vadd.f32 %v762_v17, %v398_v11  ;;  %v496_v19 = vpop.f32.mrb[5].mxu1  ;;  %820 = vmatprep.subr.bf16.mxu0 %v865_v60 }
 0x1de   :  { %v821_v20 = vpack.c.bf16 %v518_v15, %v517_v16  ;;  %v497_v21 = vadd.f32 %v496_v19, %v393_v14 }
 0x1df   :  { %v520_v22 = vmax.f32 %v502_v18, 0.0 }
 0x1e0   :  { %v519_v24 = vmax.f32 %v497_v21, 0.0  ;;  %v765_v25 = vpop.f32.mrb[6].mxu1  ;;  %822 = vmatpush3.bf16.msra.mxu0 %v821_v20 }
 0x1e1   :  { %v512_v27 = vadd.f32 %v765_v25, %v408_v23  ;;  %v506_v28 = vpop.f32.mrb[7].mxu1  ;;  %823 = vmatprep.subr.bf16.mxu0 %v865_v60 }
 0x1e2   :  { %v824_v29 = vpack.c.bf16 %v520_v22, %v519_v24  ;;  %v507_v30 = vadd.f32 %v506_v28, %v403_v26 }
 0x1e3   :  { %v522_v31 = vmax.f32 %v512_v27, 0.0 }
 0x1e4   :  { %v521_v32 = vmax.f32 %v507_v30, 0.0  ;;  %825 = vmatpush3.bf16.msra.mxu0 %v824_v29 }
 0x1e5   :  { %826 = vmatprep.subr.bf16.mxu0 %v865_v60 }
 0x1e6   :  { %v827_v33 = vpack.c.bf16 %v522_v31, %v521_v32 }
 0x1e8   :  { %828 = vmatpush3.bf16.msra.mxu0 %v827_v33 }
 0x1eb   :  { %783 = vmatmul.mubr.msk.f32.vlgmr.msra.gmra.mrb[16].mxu0 %vm523_vm2, %v77_v34 }
 0x2be   :  { %v593_v40 = vpop.f32.mrb[16].mxu0 }
 0x2bf   :  { %v606_v41 = vadd.f32 %v605_v39, %v593_v40  ;;  %v784_v42 = vpop.f32.mrb[17].mxu0 }
 0x2c1   :  { %v645_v43 = vmul.f32 -1.442695, %v606_v41 }
 0x2c3   :  { %836 = vpow2.f32 %v645_v43 }
 0x2cd   :  { %v837_v44 = vpop.eup %836 }
 0x2ce   :  { %v610_v45 = vadd.f32 1.0, %v837_v44 }
 0x2d0   :  { %838 = vrcp.f32 %v610_v45 }
 0x2da   :  { %v839_v46 = vpop.eup %838 }
 0x2db   :  { %613 = vst [vmem:[#allocation3] sm:$0x1] %v839_v46 }
 0x2dc   :  { %851 = shalt.err (!%p848_p4)
}
 0x2dd   :  { %s852_s25 = scalar_lea.hbm %s1097_s7, 16 }
 0x2de   :  { %p853_p5 = scmp.ne.s32.totalorder %s1097_s7, %s852_s25  ;;  %p856_p6 = scmp.lt.u32.totalorder %s852_s25, %s1097_s7 }
 0x2e0   :  { %p858_p7 = pnand %p856_p6, %p853_p5 }
 0x2e2   :  { %861 = shalt.err (!%p858_p7)
}
 0x2e3   :  { %623 = dma.vmem_to_hbm [thread:$0]  %s621_s22, 16, %s1097_s7, [#allocation4]  }
 0x2e4   :  { %862 = dma.done.wait [#allocation4], 16  }
 0x2e5   :  { %863 = vsyncadd [#allocation4], 4294967280 }
 0x2e6   :  { %627 = vsyncpa [#allocation4], 1 }

</bundles_post_ra>
